<compile_context>
chip_gen: v7x
topology: tpu7x:2x2x1
jax: 0.10.0
libtpu: 0.0.40
codegen_flags: <defaults>
</compile_context>

<pallas_src>
import jax
import jax.numpy as jnp
from jax.experimental import pallas as pl
from jax.experimental.pallas import tpu as pltpu

RAY_DIM = 3   # the module's ray is a 3-simplex point
RAY_PAD = 8   # pad to a full sublane for a clean (1, 8) @ (8, H) MXU feed


# ----------------------------- Pallas kernels ------------------------------

def _ray_mlp_kernel(ray_p_ref, ray_in_ref, w1_ref, b1_ref, w2_ref, b2_ref,
                    w3_ref, b3_ref, feat_ref):
    # ray = self.ray * softmax(_ray); padded lanes of _ray are -1e30 -> exp()=0,
    # padded lanes of self.ray are 0, and padded rows of w1 are 0.
    r = ray_in_ref[...]
    e = jnp.exp(r - jnp.max(r, axis=-1, keepdims=True))
    sm = e / jnp.sum(e, axis=-1, keepdims=True)
    ray = ray_p_ref[...] * sm                                           # (1, 8)

    h = jnp.dot(ray, w1_ref[...], preferred_element_type=jnp.float32) + b1_ref[...]
    h = jnp.maximum(h, 0.0)
    h = jnp.dot(h, w2_ref[...], preferred_element_type=jnp.float32) + b2_ref[...]
    h = jnp.maximum(h, 0.0)
    f = jnp.dot(h, w3_ref[...], preferred_element_type=jnp.float32) + b3_ref[...]
    feat_ref[...] = f.astype(feat_ref.dtype)                            # (1, H)


def _head_kernel(f_ref, w_ref, b_ref, o_ref):
    # one lane-dense column tile of: features @ Wb + bb
    o_ref[...] = (jnp.dot(f_ref[...], w_ref[...],
                          preferred_element_type=jnp.float32)
                  + b_ref[...]).astype(o_ref.dtype)


# ------------------------------- wrappers -----------------------------------

def _full_spec(shape):
    return pl.BlockSpec(shape, lambda i: (0, 0))


def _ray_mlp(ray_p, ray_in, w1, b1, w2, b2, w3, b3):
    H = w1.shape[1]
    return pl.pallas_call(
        _ray_mlp_kernel,
        out_shape=jax.ShapeDtypeStruct((1, H), jnp.float32),
        grid=(1,),
        in_specs=[_full_spec(ray_p.shape), _full_spec(ray_in.shape),
                  _full_spec(w1.shape), _full_spec(b1.shape),
                  _full_spec(w2.shape), _full_spec(b2.shape),
                  _full_spec(w3.shape), _full_spec(b3.shape)],
        out_specs=_full_spec((1, H)),
        compiler_params=pltpu.CompilerParams(
            dimension_semantics=("arbitrary",)),
    )(ray_p, ray_in, w1, b1, w2, b2, w3, b3)


def _head(features, wb, bb, *, tile_n):
    H, n_pad = wb.shape
    assert n_pad % tile_n == 0 and tile_n % 128 == 0
    return pl.pallas_call(
        _head_kernel,
        out_shape=jax.ShapeDtypeStruct((1, n_pad), jnp.float32),
        grid=(n_pad // tile_n,),
        in_specs=[
            pl.BlockSpec((1, H), lambda j: (0, 0)),
            pl.BlockSpec((H, tile_n), lambda j: (0, j)),
            pl.BlockSpec((1, tile_n), lambda j: (0, j)),
        ],
        out_specs=pl.BlockSpec((1, tile_n), lambda j: (0, j)),
        compiler_params=pltpu.CompilerParams(
            dimension_semantics=("parallel",)),
    )(features, wb, bb)


def hnet_forward(params, _ray=None, *, target_net_in_features, out_dim,
                 n_expert, tile_n=512):
    """Eval-mode hnet forward. Returns {'backbone.linears{j}.weights': (in_f, out_dim)}."""
    if _ray is None:
        # TODO(synk): training mode samples _ray from a host-side Dirichlet (numpy RNG);
        # the deterministic eval-mode path (_ray = ones) is implemented here.
        _ray = jnp.ones((RAY_DIM,), jnp.float32)

    ray_p = jnp.zeros((1, RAY_PAD), jnp.float32).at[0, :RAY_DIM].set(params["ray"])
    ray_i = jnp.full((1, RAY_PAD), -1e30, jnp.float32).at[0, :RAY_DIM].set(_ray)

    features = _ray_mlp(ray_p, ray_i,
                        params["w1"], params["b1"],
                        params["w2"], params["b2"],
                        params["w3"], params["b3"])

    flat = _head(features, params["wb"], params["bb"], tile_n=tile_n)

    n_out = target_net_in_features * out_dim
    flat = flat[0, :n_expert * n_out]
    out = {}
    for j in range(n_expert):
        out[f"backbone.linears{j}.weights"] = (
            flat[j * n_out:(j + 1) * n_out].reshape(target_net_in_features, out_dim))
    return out


# ---------------------------- pure-JAX reference ---------------------------

def reference_forward(params, _ray, *, target_net_in_features, out_dim, n_expert):
    hp = jax.lax.Precision.HIGHEST
    ray = params["ray"] * jax.nn.softmax(_ray)
    x = ray[None, :]
    h = jax.nn.relu(jnp.dot(x, params["w1"][:RAY_DIM], precision=hp) + params["b1"])
    h = jax.nn.relu(jnp.dot(h, params["w2"], precision=hp) + params["b2"])
    f = jnp.dot(h, params["w3"], precision=hp) + params["b3"]
    flat = jnp.dot(f, params["wb"], precision=hp) + params["bb"]
    n_out = target_net_in_features * out_dim
    flat = flat[0, :n_expert * n_out]
    out = {}
    for j in range(n_expert):
        out[f"backbone.linears{j}.weights"] = (
            flat[j * n_out:(j + 1) * n_out].reshape(target_net_in_features, out_dim))
    return out


# --------------------------------- main -------------------------------------

if __name__ == "__main__":
    # Module defaults (small): out_dim=10, target_net_in_features=50,
    # ray_hidden_dim=128, n_expert=3, use_norm=True (so no bias head).
    out_dim = 10
    target_net_in_features = 50
    ray_hidden_dim = 128
    n_expert = 3

    H = ray_hidden_dim
    n_total = n_expert * target_net_in_features * out_dim        # 1500
    n_pad = ((n_total + 127) // 128) * 128                        # 1536 (lane-dense)
    tile_n = 512

    key = jax.random.PRNGKey(0)
    ks = jax.random.split(key, 9)
    ray_param = jax.random.dirichlet(ks[0], jnp.ones((RAY_DIM,), jnp.float32))
    w1 = jax.random.normal(ks[1], (RAY_DIM, H), jnp.float32) * 0.3   # (in, out) layout
    b1 = jax.random.normal(ks[2], (1, H), jnp.float32) * 0.1
    w2 = jax.random.normal(ks[3], (H, H), jnp.float32) * 0.1
    b2 = jax.random.normal(ks[4], (1, H), jnp.float32) * 0.1
    w3 = jax.random.normal(ks[5], (H, H), jnp.float32) * 0.1
    b3 = jax.random.normal(ks[6], (1, H), jnp.float32) * 0.1
    wb = jax.random.normal(ks[7], (H, n_total), jnp.float32) * 0.1
    bb = jax.random.normal(ks[8], (1, n_total), jnp.float32) * 0.1

    params = dict(
        ray=ray_param,
        w1=jnp.pad(w1, ((0, RAY_PAD - RAY_DIM), (0, 0))),   # (8, H), zero pad rows
        b1=b1, w2=w2, b2=b2, w3=w3, b3=b3,
        wb=jnp.pad(wb, ((0, 0), (0, n_pad - n_total))),     # (H, 1536), zero pad cols
        bb=jnp.pad(bb, ((0, 0), (0, n_pad - n_total))),     # (1, 1536)
    )

    out = hnet_forward(params, None,
                       target_net_in_features=target_net_in_features,
                       out_dim=out_dim, n_expert=n_expert, tile_n=tile_n)
    out = jax.block_until_ready(out)

    ref = reference_forward(params, jnp.ones((RAY_DIM,), jnp.float32),
                            target_net_in_features=target_net_in_features,
                            out_dim=out_dim, n_expert=n_expert)
    ref = jax.block_until_ready(ref)

    for j in range(n_expert):
        k_name = f"backbone.linears{j}.weights"
        o, r = out[k_name], ref[k_name]
        assert o.shape == (target_net_in_features, out_dim), o.shape
        assert jnp.allclose(o, r, rtol=2e-3, atol=2e-3), (
            k_name, float(jnp.max(jnp.abs(o - r))))

    print("KERNEL_OK")
</pallas_src>

<mosaic_0001>
module attributes {stable_mosaic.version = 11 : i64} {
  func.func @_ray_mlp_kernel(%arg0: i32, %arg1: memref<1x8xf32, #tpu.memory_space<vmem>>, %arg2: memref<1x8xf32, #tpu.memory_space<vmem>>, %arg3: memref<8x128xf32, #tpu.memory_space<vmem>>, %arg4: memref<1x128xf32, #tpu.memory_space<vmem>>, %arg5: memref<128x128xf32, #tpu.memory_space<vmem>>, %arg6: memref<1x128xf32, #tpu.memory_space<vmem>>, %arg7: memref<128x128xf32, #tpu.memory_space<vmem>>, %arg8: memref<1x128xf32, #tpu.memory_space<vmem>>, %arg9: memref<1x128xf32, #tpu.memory_space<vmem>>) attributes {dimension_semantics = [#tpu.dimension_semantics<arbitrary>], iteration_bounds = array<i64: 1>, scalar_prefetch = 0 : i64, scratch_operands = 0 : i64, tpu.core_type = #tpu.core_type<tc>, window_params = [{pipeline_mode = #tpu.pipeline_mode<synchronous>, transform_indices = @transform_0, window_bounds = array<i64: 1, 8>}, {pipeline_mode = #tpu.pipeline_mode<synchronous>, transform_indices = @transform_1, window_bounds = array<i64: 1, 8>}, {pipeline_mode = #tpu.pipeline_mode<synchronous>, transform_indices = @transform_2, window_bounds = array<i64: 8, 128>}, {pipeline_mode = #tpu.pipeline_mode<synchronous>, transform_indices = @transform_3, window_bounds = array<i64: 1, 128>}, {pipeline_mode = #tpu.pipeline_mode<synchronous>, transform_indices = @transform_4, window_bounds = array<i64: 128, 128>}, {pipeline_mode = #tpu.pipeline_mode<synchronous>, transform_indices = @transform_5, window_bounds = array<i64: 1, 128>}, {pipeline_mode = #tpu.pipeline_mode<synchronous>, transform_indices = @transform_6, window_bounds = array<i64: 128, 128>}, {pipeline_mode = #tpu.pipeline_mode<synchronous>, transform_indices = @transform_7, window_bounds = array<i64: 1, 128>}, {pipeline_mode = #tpu.pipeline_mode<synchronous>, transform_indices = @transform_8, window_bounds = array<i64: 1, 128>}]} {
    %c0 = arith.constant 0 : index
    %c0_0 = arith.constant 0 : index
    %0 = vector.load %arg2[%c0, %c0_0] : memref<1x8xf32, #tpu.memory_space<vmem>>, vector<1x8xf32>
    %cst = arith.constant dense<0xFF800000> : vector<1xf32>
    %1 = vector.multi_reduction <maximumf>, %0, %cst [1] : vector<1x8xf32> to vector<1xf32>
    %2 = vector.shape_cast %1 : vector<1xf32> to vector<1x1xf32>
    %3 = vector.broadcast %2 : vector<1x1xf32> to vector<1x8xf32>
    %4 = arith.subf %0, %3 : vector<1x8xf32>
    %5 = math.exp %4 : vector<1x8xf32>
    %cst_1 = arith.constant dense<0.000000e+00> : vector<1xf32>
    %6 = vector.multi_reduction <add>, %5, %cst_1 [1] : vector<1x8xf32> to vector<1xf32>
    %7 = vector.shape_cast %6 : vector<1xf32> to vector<1x1xf32>
    %8 = vector.broadcast %7 : vector<1x1xf32> to vector<1x8xf32>
    %9 = arith.divf %5, %8 : vector<1x8xf32>
    %c0_2 = arith.constant 0 : index
    %c0_3 = arith.constant 0 : index
    %10 = vector.load %arg1[%c0_2, %c0_3] : memref<1x8xf32, #tpu.memory_space<vmem>>, vector<1x8xf32>
    %11 = arith.mulf %10, %9 : vector<1x8xf32>
    %c0_4 = arith.constant 0 : index
    %c0_5 = arith.constant 0 : index
    %12 = vector.load %arg3[%c0_4, %c0_5] : memref<8x128xf32, #tpu.memory_space<vmem>>, vector<8x128xf32>
    %cst_6 = arith.constant dense<0.000000e+00> : vector<1x128xf32>
    %13 = tpu.matmul %11, %12, %cst_6 {dimension_numbers = #tpu.dot_dimension_numbers<[1], [0], [0], [1], [0, 0, 1, 1], [], []>} : vector<1x8xf32>, vector<8x128xf32>, vector<1x128xf32> -> vector<1x128xf32>
    %c0_7 = arith.constant 0 : index
    %c0_8 = arith.constant 0 : index
    %14 = vector.load %arg4[%c0_7, %c0_8] : memref<1x128xf32, #tpu.memory_space<vmem>>, vector<1x128xf32>
    %15 = arith.addf %13, %14 : vector<1x128xf32>
    %cst_9 = arith.constant 0.000000e+00 : f32
    %16 = vector.broadcast %cst_9 : f32 to vector<1x128xf32>
    %17 = arith.maximumf %15, %16 : vector<1x128xf32>
    %c0_10 = arith.constant 0 : index
    %c0_11 = arith.constant 0 : index
    %18 = vector.load %arg5[%c0_10, %c0_11] : memref<128x128xf32, #tpu.memory_space<vmem>>, vector<128x128xf32>
    %cst_12 = arith.constant dense<0.000000e+00> : vector<1x128xf32>
    %19 = tpu.matmul %17, %18, %cst_12 {dimension_numbers = #tpu.dot_dimension_numbers<[1], [0], [0], [1], [0, 0, 1, 1], [], []>} : vector<1x128xf32>, vector<128x128xf32>, vector<1x128xf32> -> vector<1x128xf32>
    %c0_13 = arith.constant 0 : index
    %c0_14 = arith.constant 0 : index
    %20 = vector.load %arg6[%c0_13, %c0_14] : memref<1x128xf32, #tpu.memory_space<vmem>>, vector<1x128xf32>
    %21 = arith.addf %19, %20 : vector<1x128xf32>
    %cst_15 = arith.constant 0.000000e+00 : f32
    %22 = vector.broadcast %cst_15 : f32 to vector<1x128xf32>
    %23 = arith.maximumf %21, %22 : vector<1x128xf32>
    %c0_16 = arith.constant 0 : index
    %c0_17 = arith.constant 0 : index
    %24 = vector.load %arg7[%c0_16, %c0_17] : memref<128x128xf32, #tpu.memory_space<vmem>>, vector<128x128xf32>
    %cst_18 = arith.constant dense<0.000000e+00> : vector<1x128xf32>
    %25 = tpu.matmul %23, %24, %cst_18 {dimension_numbers = #tpu.dot_dimension_numbers<[1], [0], [0], [1], [0, 0, 1, 1], [], []>} : vector<1x128xf32>, vector<128x128xf32>, vector<1x128xf32> -> vector<1x128xf32>
    %c0_19 = arith.constant 0 : index
    %c0_20 = arith.constant 0 : index
    %26 = vector.load %arg8[%c0_19, %c0_20] : memref<1x128xf32, #tpu.memory_space<vmem>>, vector<1x128xf32>
    %27 = arith.addf %25, %26 : vector<1x128xf32>
    %c0_21 = arith.constant 0 : index
    %c0_22 = arith.constant 0 : index
    %28 = vector.load %arg9[%c0_21, %c0_22] : memref<1x128xf32, #tpu.memory_space<vmem>>, vector<1x128xf32>
    tpu.vector_store %arg9[%c0_21, %c0_22], %27 {strides = array<i32>} : memref<1x128xf32, #tpu.memory_space<vmem>>, vector<1x128xf32>,
    return
  }
  func.func @transform_0(%arg0: i32) -> (i32, i32) {
    %c0_i32 = arith.constant 0 : i32
    %c0_i32_0 = arith.constant 0 : i32
    %c0_i32_1 = arith.constant 0 : i32
    return %c0_i32, %c0_i32_0 : i32, i32
  }
  func.func @transform_1(%arg0: i32) -> (i32, i32) {
    %c0_i32 = arith.constant 0 : i32
    %c0_i32_0 = arith.constant 0 : i32
    %c0_i32_1 = arith.constant 0 : i32
    return %c0_i32, %c0_i32_0 : i32, i32
  }
  func.func @transform_2(%arg0: i32) -> (i32, i32) {
    %c0_i32 = arith.constant 0 : i32
    %c0_i32_0 = arith.constant 0 : i32
    %c0_i32_1 = arith.constant 0 : i32
    return %c0_i32, %c0_i32_0 : i32, i32
  }
  func.func @transform_3(%arg0: i32) -> (i32, i32) {
    %c0_i32 = arith.constant 0 : i32
    %c0_i32_0 = arith.constant 0 : i32
    %c0_i32_1 = arith.constant 0 : i32
    return %c0_i32, %c0_i32_0 : i32, i32
  }
  func.func @transform_4(%arg0: i32) -> (i32, i32) {
    %c0_i32 = arith.constant 0 : i32
    %c0_i32_0 = arith.constant 0 : i32
    %c0_i32_1 = arith.constant 0 : i32
    return %c0_i32, %c0_i32_0 : i32, i32
  }
  func.func @transform_5(%arg0: i32) -> (i32, i32) {
    %c0_i32 = arith.constant 0 : i32
    %c0_i32_0 = arith.constant 0 : i32
    %c0_i32_1 = arith.constant 0 : i32
    return %c0_i32, %c0_i32_0 : i32, i32
  }
  func.func @transform_6(%arg0: i32) -> (i32, i32) {
    %c0_i32 = arith.constant 0 : i32
    %c0_i32_0 = arith.constant 0 : i32
    %c0_i32_1 = arith.constant 0 : i32
    return %c0_i32, %c0_i32_0 : i32, i32
  }
  func.func @transform_7(%arg0: i32) -> (i32, i32) {
    %c0_i32 = arith.constant 0 : i32
    %c0_i32_0 = arith.constant 0 : i32
    %c0_i32_1 = arith.constant 0 : i32
    return %c0_i32, %c0_i32_0 : i32, i32
  }
  func.func @transform_8(%arg0: i32) -> (i32, i32) {
    %c0_i32 = arith.constant 0 : i32
    %c0_i32_0 = arith.constant 0 : i32
    %c0_i32_1 = arith.constant 0 : i32
    return %c0_i32, %c0_i32_0 : i32, i32
  }
}

</mosaic_0001>

<bundles_post_ra>
// kernel: tpu_custom_call.1
= control target key start
LH: loop header
LB: loop body
LE: loop exit
PB: predicated region body
PF: predicated region fallthrough
CT: control target
= control target key end

     0   :  { %13 = vsyncpa [#allocation3], 0  ;;  %s804_s0 = inlined_call_operand.hbm [shape: f32[1,8], index: 0, kind: input, shape index: {}]   ;;  %s805_s1 = inlined_call_operand.vmem [shape: f32[1,8], index: 1, kind: input, shape index: {}]   ;;  %s806_s2 = inlined_call_operand.hbm [shape: f32[8,128], index: 2, kind: input, shape index: {}]   ;;  %s807_s3 = inlined_call_operand.vmem [shape: f32[1,128], index: 3, kind: input, shape index: {}]   ;;  %s808_s4 = inlined_call_operand.hbm [shape: f32[128,128], index: 4, kind: input, shape index: {}]   ;;  %s809_s5 = inlined_call_operand.vmem [shape: f32[1,128], index: 5, kind: input, shape index: {}]   ;;  %s810_s6 = inlined_call_operand.hbm [shape: f32[128,128], index: 6, kind: input, shape index: {}]   ;;  %s811_s7 = inlined_call_operand.vmem [shape: f32[1,128], index: 7, kind: input, shape index: {}]   ;;  %s812_s8 = inlined_call_operand.hbm [shape: f32[1,128], index: 8, kind: output, shape index: {}]  }
   0x1   :  { %14 = vsyncpa [#allocation6], 0 }
   0x2   :  { %15 = vsyncpa [#allocation9], 0 }
   0x3   :  { %16 = vsyncpa [#allocation4], 0  ;;  %s658_s27 = smov [#allocation5]   ;;  %s659_s29 = smov [#allocation2]  }
   0x4   :  { %s35_s28 = sshll.u32 %s658_s27, 4  ;;  %s23_s30 = sshll.u32 %s659_s29, 4  ;;  %s36_s28 = int_to_ptr.vmem [resolvable:$true] %s35_s28  ;;  %s24_s30 = int_to_ptr.vmem [resolvable:$true] %s23_s30 }
   0x5   :  { %s540_s11 = scalar_lea.hbm %s806_s2, 128 }
   0x6   :  { %p541_p0 = scmp.ne.s32.totalorder %s806_s2, %s540_s11  ;;  %p544_p1 = scmp.lt.u32.totalorder %s540_s11, %s806_s2 }
   0x8   :  { %p546_p2 = pnand %p544_p1, %p541_p0 }
   0xa   :  { %549 = shalt.err (!%p546_p2)
}
   0xb   :  { %s550_s16 = scalar_lea.vmem %s36_s28, 128  ;;  %p555_p4 = scmp.lt.s32.totalorder %s36_s28, %s36_s28 }
   0xc   :  { %p551_p3 = scmp.ne.s32.totalorder %s36_s28, %s550_s16  ;;  %p556_p5 = scmp.lt.s32.totalorder %s550_s16, %s550_s16 }
   0xe   :  { %p557_p6 = por %p556_p5, %p555_p4 }
  0x10   :  { %p558_p7 = pnand %p557_p6, %p551_p3 }
  0x12   :  { %561 = shalt.err (!%p558_p7)
}
  0x13   :  { %38 = dma.hbm_to_vmem [thread:$0]  %s806_s2, 128, %s36_s28, [#allocation6]  }
  0x14   :  { %s562_s21 = scalar_lea.hbm %s804_s0, 16 }
  0x15   :  { %p563_p8 = scmp.ne.s32.totalorder %s804_s0, %s562_s21  ;;  %p566_p9 = scmp.lt.u32.totalorder %s562_s21, %s804_s0 }
  0x17   :  { %p568_p10 = pnand %p566_p9, %p563_p8 }
  0x19   :  { %571 = shalt.err (!%p568_p10)
}
  0x1a   :  { %s572_s26 = scalar_lea.vmem %s24_s30, 16  ;;  %s576_s27 = scalar_lea.vmem %s24_s30, 32 }
  0x1b   :  { %p573_p11 = scmp.ne.s32.totalorder %s24_s30, %s572_s26  ;;  %p577_p12 = scmp.lt.s32.totalorder %s24_s30, %s24_s30 }
  0x1c   :  { %p578_p13 = scmp.lt.s32.totalorder %s576_s27, %s572_s26 }
  0x1e   :  { %p579_p0 = por %p578_p13, %p577_p12 }
  0x20   :  { %p580_p1 = pnand %p579_p0, %p573_p11 }
  0x22   :  { %583 = shalt.err (!%p580_p1)
}
  0x23   :  { %26 = dma.hbm_to_vmem [thread:$0]  %s804_s0, 16, %s24_s30, [#allocation3]  }
  0x24   :  { %s660_s29 = smov [#allocation7]   ;;  %s584_s12 = scalar_lea.hbm %s808_s4, 2048 }
  0x25   :  { %s46_s9 = sshll.u32 %s660_s29, 4  ;;  %p585_p2 = scmp.ne.s32.totalorder %s808_s4, %s584_s12  ;;  %s47_s9 = int_to_ptr.vmem [resolvable:$true] %s46_s9 }
  0x26   :  { %p588_p3 = scmp.lt.u32.totalorder %s584_s12, %s808_s4 }
  0x28   :  { %p590_p4 = pnand %p588_p3, %p585_p2 }
  0x2a   :  { %593 = shalt.err (!%p590_p4)
}
  0x2b   :  { %s594_s17 = scalar_lea.vmem %s47_s9, 2048  ;;  %p599_p6 = scmp.lt.s32.totalorder %s47_s9, %s47_s9 }
  0x2c   :  { %p595_p5 = scmp.ne.s32.totalorder %s47_s9, %s594_s17  ;;  %p600_p7 = scmp.lt.s32.totalorder %s594_s17, %s594_s17 }
  0x2e   :  { %p601_p8 = por %p600_p7, %p599_p6 }
  0x30   :  { %p602_p9 = pnand %p601_p8, %p595_p5 }
  0x32   :  { %605 = shalt.err (!%p602_p9)
}
  0x33   :  { %s661_s0 = smov 128   ;;  %s662_s30 = smov 8  }
  0x34   :  { %52 = dma.hbm_to_vmem [thread:$0]  %s808_s4, 2048, %s47_s9, [#allocation6], %s661_s0, %s661_s0, %s662_s30  }
  0x35   :  { %s663_s20 = smov [#allocation8]   ;;  %s606_s24 = scalar_lea.hbm %s810_s6, 2048 }
  0x36   :  { %s60_s21 = sshll.u32 %s663_s20, 4  ;;  %p607_p10 = scmp.ne.s32.totalorder %s810_s6, %s606_s24  ;;  %s61_s21 = int_to_ptr.vmem [resolvable:$true] %s60_s21 }
  0x37   :  { %p610_p11 = scmp.lt.u32.totalorder %s606_s24, %s810_s6 }
  0x39   :  { %p612_p12 = pnand %p610_p11, %p607_p10 }
  0x3b   :  { %615 = shalt.err (!%p612_p12)
}
  0x3c   :  { %s616_s28 = scalar_lea.vmem %s61_s21, 2048  ;;  %p621_p0 = scmp.lt.s32.totalorder %s61_s21, %s61_s21 }
  0x3d   :  { %p617_p13 = scmp.ne.s32.totalorder %s61_s21, %s616_s28  ;;  %p622_p1 = scmp.lt.s32.totalorder %s616_s28, %s616_s28 }
  0x3f   :  { %p623_p2 = por %p622_p1, %p621_p0 }
  0x41   :  { %p624_p3 = pnand %p623_p2, %p617_p13 }
  0x43   :  { %627 = shalt.err (!%p624_p3)
}
  0x44   :  { %66 = dma.hbm_to_vmem [thread:$0]  %s810_s6, 2048, %s61_s21, [#allocation9], %s661_s0, %s661_s0, %s662_s30  }
  0x45   :  { %650 = dma.done.wait [#allocation3], 16  }
  0x46   :  { %651 = vsyncadd [#allocation3], 4294967280 }
  0x47   :  { %652 = dma.done.wait [#allocation6], 2176  }
  0x48   :  { %653 = vsyncadd [#allocation6], 4294965120 }
  0x49   :  { %654 = dma.done.wait [#allocation9], 2048  }
  0x4a   :  { %655 = vsyncadd [#allocation9], 4294965248  ;;  %vm82_vm0 = vcmask 57344   ;;  %v81_v0 = vld [vmem:[%s805_s1] sm:$0x1]  ;;  %v96_v7 = vld [vmem:[#allocation5] sm:$0xff] }
  0x4b   :  { %v83_v1 = vsel %vm82_vm0, %v81_v0, -inf  ;;  %v664_v8 = vmov 0.0   ;;  %vm665_vm1 = vmmov 0   ;;  %v173_v9 = vld [vmem:[#allocation7] sm:$0xff]  ;;  %v174_v10 = vld [vmem:[#allocation7 + $0x8] sm:$0xff]  ;;  %v175_v11 = vld [vmem:[#allocation7 + $0x10] sm:$0xff] }
  0x4c   :  { %84 = vmax.xlane.f32.xlu0 %v83_v1  ;;  %403 = vmatprep.subr.mxu0 %v664_v8  ;;  %v666_v12 = vmov 0.0|0.0   ;;  %v479_v13 = vpack.c.bf16 %v174_v10, %v173_v9  ;;  %v176_v14 = vld [vmem:[#allocation7 + $0x18] sm:$0xff]  ;;  %v177_v16 = vld [vmem:[#allocation7 + $0x20] sm:$0xff]  ;;  %v178_v17 = vld [vmem:[#allocation7 + $0x28] sm:$0xff]  ;;  %vm98_vm2 = vcmask 64512   ;;  %s667_s14 = smov [#allocation10]  }
  0x4d   :  { %405 = vmatprep.mubr.msk.f32.mxu0 %vm665_vm1, %v664_v8  ;;  %404 = vmatpush3.msra.mxu0 %v96_v7  ;;  %v482_v15 = vpack.c.bf16 %v176_v14, %v175_v11  ;;  %v485_v18 = vpack.c.bf16 %v178_v17, %v177_v16  ;;  %v179_v19 = vld [vmem:[#allocation7 + $0x30] sm:$0xff]  ;;  %v180_v20 = vld [vmem:[#allocation7 + $0x38] sm:$0xff]  ;;  %v181_v22 = vld [vmem:[#allocation7 + $0x40] sm:$0xff]  ;;  %s355_s15 = sshll.u32 %s667_s14, 4  ;;  %s356_s15 = int_to_ptr.vmem [resolvable:$true] %s355_s15 }
  0x4e   :  { %440 = vmatprep.mubr.msk.f32.mxu1 %vm665_vm1, %v664_v8  ;;  %478 = vmatprep.subr.bf16.mxu1 %v666_v12  ;;  %v488_v21 = vpack.c.bf16 %v180_v20, %v179_v19  ;;  %v182_v23 = vld [vmem:[#allocation7 + $0x48] sm:$0xff]  ;;  %v183_v25 = vld [vmem:[#allocation7 + $0x50] sm:$0xff]  ;;  %v184_v26 = vld [vmem:[#allocation7 + $0x58] sm:$0xff]  ;;  %s628_s16 = scalar_lea.vmem %s356_s15, 16  ;;  %s632_s17 = scalar_lea.vmem %s356_s15, 32 }
  0x4f   :  { %502 = vmatprep.subr.bf16.mxu0 %v666_v12  ;;  %480 = vmatpush3.bf16.msra.mxu1 %v479_v13  ;;  %v491_v24 = vpack.c.bf16 %v182_v23, %v181_v22  ;;  %v494_v27 = vpack.c.bf16 %v184_v26, %v183_v25  ;;  %v185_v28 = vld [vmem:[#allocation7 + $0x60] sm:$0xff]  ;;  %v186_v29 = vld [vmem:[#allocation7 + $0x68] sm:$0xff]  ;;  %v94_v33 = vld [vmem:[#allocation2] sm:$0x1]  ;;  %p629_p4 = scmp.ne.s32.totalorder %s356_s15, %s628_s16  ;;  %p633_p5 = scmp.lt.s32.totalorder %s356_s15, %s356_s15 }
  0x50   :  { %481 = vmatprep.subr.bf16.mxu1 %v666_v12  ;;  %v497_v30 = vpack.c.bf16 %v186_v29, %v185_v28  ;;  %v187_v36 = vld [vmem:[#allocation7 + $0x70] sm:$0xff]  ;;  %v188_v37 = vld [vmem:[#allocation7 + $0x78] sm:$0xff]  ;;  %v261_v39 = vld [vmem:[#allocation8] sm:$0xff]  ;;  %p634_p6 = scmp.lt.s32.totalorder %s632_s17, %s628_s16 }
  0x51   :  { %v500_v38 = vpack.c.bf16 %v188_v37, %v187_v36  ;;  %v262_v40 = vld [vmem:[#allocation8 + $0x8] sm:$0xff]  ;;  %v263_v41 = vld [vmem:[#allocation8 + $0x10] sm:$0xff]  ;;  %v264_v43 = vld [vmem:[#allocation8 + $0x18] sm:$0xff] }
  0x52   :  { %v503_v42 = vpack.c.bf16 %v262_v40, %v261_v39  ;;  %v506_v44 = vpack.c.bf16 %v264_v43, %v263_v41  ;;  %v265_v45 = vld [vmem:[#allocation8 + $0x20] sm:$0xff]  ;;  %v266_v46 = vld [vmem:[#allocation8 + $0x28] sm:$0xff]  ;;  %v267_v48 = vld [vmem:[#allocation8 + $0x30] sm:$0xff]  ;;  %p635_p7 = por %p634_p6, %p633_p5 }
  0x53   :  { %483 = vmatpush3.bf16.msra.mxu1 %v482_v15  ;;  %v509_v47 = vpack.c.bf16 %v266_v46, %v265_v45  ;;  %v268_v49 = vld [vmem:[#allocation8 + $0x38] sm:$0xff]  ;;  %v269_v51 = vld [vmem:[#allocation8 + $0x40] sm:$0xff]  ;;  %v270_v52 = vld [vmem:[#allocation8 + $0x48] sm:$0xff] }
  0x54   :  { %484 = vmatprep.subr.bf16.mxu1 %v666_v12  ;;  %v512_v50 = vpack.c.bf16 %v268_v49, %v267_v48  ;;  %v515_v53 = vpack.c.bf16 %v270_v52, %v269_v51  ;;  %v271_v54 = vld [vmem:[#allocation8 + $0x50] sm:$0xff]  ;;  %v272_v55 = vld [vmem:[#allocation8 + $0x58] sm:$0xff]  ;;  %v273_v57 = vld [vmem:[#allocation8 + $0x60] sm:$0xff]  ;;  %p636_p8 = pnand %p635_p7, %p629_p4 }
  0x55   :  { %v518_v56 = vpack.c.bf16 %v272_v55, %v271_v54  ;;  %v274_v58 = vld [vmem:[#allocation8 + $0x68] sm:$0xff]  ;;  %v97_v60 = vld [vmem:[%s807_s3] sm:$0x1] }
  0x56   :  { %v521_v59 = vpack.c.bf16 %v274_v58, %v273_v57  ;;  %v275_v1 = vld [vmem:[#allocation8 + $0x70] sm:$0xff] }
  0x57   :  { %486 = vmatpush3.bf16.msra.mxu1 %v485_v18  ;;  %v277_v9 = vld [vmem:[%s811_s7] sm:$0x1] }
  0x58   :  { %487 = vmatprep.subr.bf16.mxu1 %v666_v12 }
  0x5b   :  { %489 = vmatpush3.bf16.msra.mxu1 %v488_v21 }
  0x5c   :  { %490 = vmatprep.subr.bf16.mxu1 %v666_v12 }
  0x5f   :  { %492 = vmatpush3.bf16.msra.mxu1 %v491_v24 }
  0x60   :  { %493 = vmatprep.subr.bf16.mxu1 %v666_v12 }
  0x63   :  { %495 = vmatpush3.bf16.msra.mxu1 %v494_v27 }
  0x64   :  { %496 = vmatprep.subr.bf16.mxu1 %v666_v12 }
  0x67   :  { %498 = vmatpush3.bf16.msra.mxu1 %v497_v30 }
  0x68   :  { %499 = vmatprep.subr.bf16.mxu1 %v666_v12 }
  0x6b   :  { %501 = vmatpush3.bf16.msra.mxu1 %v500_v38 }
  0xd9   :  { %v85_v2 = vpop.xlane.xlu0 %84 }
  0xda   :  { %v86_v3 = vsub.f32 %v81_v0, %v85_v2  ;;  %v276_v2 = vld [vmem:[#allocation8 + $0x78] sm:$0xff] }
  0xdc   :  { %v87_v4 = vmul.f32 1.442695, %v86_v3  ;;  %v524_v3 = vpack.c.bf16 %v276_v2, %v275_v1 }
  0xde   :  { %536 = vpow2.f32 %v87_v4  ;;  %v189_v4 = vld [vmem:[%s809_s5] sm:$0x1] }
  0xe8   :  { %v537_v5 = vpop.eup %536 }
  0xe9   :  { %v89_v6 = vsel %vm82_vm0, %v537_v5, 0.0 }
  0xea   :  { %90 = vadd.xlane.f32.xlu0 %v89_v6 }
 0x177   :  { %v91_v31 = vpop.xlane.xlu0 %90 }
 0x178   :  { %538 = vrcp.f32 %v91_v31 }
 0x182   :  { %v539_v32 = vpop.eup %538 }
 0x183   :  { %v93_v34 = vmul.f32 %v539_v32, %v537_v5 }
 0x185   :  { %v95_v35 = vmul.f32 %v94_v33, %v93_v34 }
 0x187   :  { %406 = vmatmul.mubr.msk.f32.vlgmr.msra.gmra.mrb[0].mxu0 %vm98_vm2, %v95_v35 }
 0x188   :  { %475 = vmatprep.mubr.msk.f32.mxu0 %vm665_vm1, %v664_v8  ;;  %504 = vmatpush3.bf16.msra.mxu0 %v503_v42 }
 0x189   :  { %505 = vmatprep.subr.bf16.mxu0 %v666_v12 }
 0x18c   :  { %507 = vmatpush3.bf16.msra.mxu0 %v506_v44 }
 0x18d   :  { %508 = vmatprep.subr.bf16.mxu0 %v666_v12 }
 0x190   :  { %510 = vmatpush3.bf16.msra.mxu0 %v509_v47 }
 0x191   :  { %511 = vmatprep.subr.bf16.mxu0 %v666_v12 }
 0x194   :  { %513 = vmatpush3.bf16.msra.mxu0 %v512_v50 }
 0x195   :  { %514 = vmatprep.subr.bf16.mxu0 %v666_v12 }
 0x198   :  { %516 = vmatpush3.bf16.msra.mxu0 %v515_v53 }
 0x199   :  { %517 = vmatprep.subr.bf16.mxu0 %v666_v12 }
 0x19c   :  { %519 = vmatpush3.bf16.msra.mxu0 %v518_v56 }
 0x19d   :  { %520 = vmatprep.subr.bf16.mxu0 %v666_v12 }
 0x1a0   :  { %522 = vmatpush3.bf16.msra.mxu0 %v521_v59 }
 0x1a1   :  { %523 = vmatprep.subr.bf16.mxu0 %v666_v12 }
 0x1a4   :  { %525 = vmatpush3.bf16.msra.mxu0 %v524_v3 }
 0x25a   :  { %v168_v61 = vpop.f32.mrb[0].mxu0 }
 0x25b   :  { %v169_v62 = vadd.f32 %v168_v61, %v97_v60  ;;  %v407_v63 = vpop.f32.mrb[1].mxu0 }
 0x25d   :  { %v172_v0 = vmax.f32 %v169_v62, 0.0 }
 0x25f   :  { %441 = vmatmul.mubr.f32.vlgmr.msra.gmra.mrb[0].mxu1 %v172_v0 }
 0x332   :  { %v256_v5 = vpop.f32.mrb[0].mxu1 }
 0x333   :  { %v257_v6 = vadd.f32 %v256_v5, %v189_v4  ;;  %v442_v7 = vpop.f32.mrb[1].mxu1 }
 0x335   :  { %v260_v8 = vmax.f32 %v257_v6, 0.0 }
 0x337   :  { %476 = vmatmul.mubr.f32.vlgmr.msra.gmra.mrb[2].mxu0 %v260_v8 }
 0x40a   :  { %v344_v10 = vpop.f32.mrb[2].mxu0 }
 0x40b   :  { %v345_v11 = vadd.f32 %v344_v10, %v277_v9  ;;  %v477_v12 = vpop.f32.mrb[3].mxu0 }
 0x40d   :  { %348 = vst [vmem:[#allocation10] sm:$0x1] %v345_v11 }
 0x40e   :  { %639 = shalt.err (!%p636_p8)
}
 0x40f   :  { %s640_s30 = scalar_lea.hbm %s812_s8, 16 }
 0x410   :  { %p641_p9 = scmp.ne.s32.totalorder %s812_s8, %s640_s30  ;;  %p644_p10 = scmp.lt.u32.totalorder %s640_s30, %s812_s8 }
 0x412   :  { %p646_p11 = pnand %p644_p10, %p641_p9 }
 0x414   :  { %649 = shalt.err (!%p646_p11)
}
 0x415   :  { %358 = dma.vmem_to_hbm [thread:$0]  %s356_s15, 16, %s812_s8, [#allocation4]  }
 0x416   :  { %656 = dma.done.wait [#allocation4], 16  }
 0x417   :  { %657 = vsyncadd [#allocation4], 4294967280 }
 0x418   :  { %362 = vsyncpa [#allocation3], 1 }
 0x419   :  { %363 = vsyncpa [#allocation6], 1 }
 0x41a   :  { %364 = vsyncpa [#allocation9], 1 }
 0x41b   :  { %365 = vsyncpa [#allocation4], 1 }

</bundles_post_ra>
